<compile_context>
chip_gen: v7x
topology: tpu7x:2x2x1
jax: 0.10.0
libtpu: 0.0.40
codegen_flags: <defaults>
</compile_context>

<pallas_src>
import jax
import jax.numpy as jnp
from jax.experimental import pallas as pl
from jax.experimental.pallas import tpu as pltpu


def _round_up(n, m):
    return ((n + m - 1) // m) * m


def _mlp_kernel(x_ref, w1_ref, b1_ref, w2_ref, b2_ref, o_ref):
    # hidden = ReLU(x @ W1 + b1): bf16 MXU matmul, f32 accumulate, f32 VPU math.
    h = jnp.dot(x_ref[...], w1_ref[...], preferred_element_type=jnp.float32)
    h = jnp.maximum(h + b1_ref[...], 0.0)
    # logits = hidden @ W2 + b2: feed bf16 back to the MXU, accumulate in f32.
    out = jnp.dot(h.astype(w2_ref.dtype), w2_ref[...],
                  preferred_element_type=jnp.float32) + b2_ref[...]
    o_ref[...] = out.astype(o_ref.dtype)


def base_model_forward(x_nchw, params):
    """Mirrors BaseModel.forward: returns None when no sequential is set."""
    if params is None:
        return None
    w1, b1, w2, b2 = params

    B = x_nchw.shape[0]
    x_flat = x_nchw.reshape(B, -1)                       # nn.Flatten()
    din = x_flat.shape[1]
    hid = w1.shape[1]
    ncls = w2.shape[1]
    assert w1.shape[0] == din and w2.shape[0] == hid

    # Lane/sublane-friendly padded sizes (last dims -> multiples of 128).
    din_p = _round_up(din, 128)
    hid_p = _round_up(hid, 128)
    ncls_p = _round_up(ncls, 128)

    # Batch tiling: multiple of 8 (f32 sublanes), cap the tile at 512 rows so
    # VMEM stays bounded regardless of B and the pipeline has >1 step to hide DMA.
    b8 = _round_up(B, 8)
    tb = min(512, b8)
    b_pad = _round_up(b8, tb)

    cdt = jnp.bfloat16  # MXU operand dtype (f32 accumulation in-kernel)

    # Zero-pad inputs/weights once; padded rows/cols contribute exactly zero.
    x_p = jnp.zeros((b_pad, din_p), cdt).at[:B, :din].set(x_flat.astype(cdt))
    w1_p = jnp.zeros((din_p, hid_p), cdt).at[:din, :hid].set(w1.astype(cdt))
    w2_p = jnp.zeros((hid_p, ncls_p), cdt).at[:hid, :ncls].set(w2.astype(cdt))
    b1_p = jnp.zeros((1, hid_p), jnp.float32).at[:, :hid].set(
        b1.reshape(1, hid).astype(jnp.float32))
    b2_p = jnp.zeros((1, ncls_p), jnp.float32).at[:, :ncls].set(
        b2.reshape(1, ncls).astype(jnp.float32))

    # VMEM budget from the actual buffers (x/out tiles double-buffered, weights
    # resident, f32 intermediates), with headroom, clamped for v7x (64 MiB VMEM).
    vmem_bytes = (
        2 * tb * din_p * 2            # x tile, double-buffered, bf16
        + 2 * tb * ncls_p * 4         # out tile, double-buffered, f32
        + 2 * din_p * hid_p * 2       # W1 (allow double-buffer slot), bf16
        + 2 * hid_p * ncls_p * 2      # W2, bf16
        + 2 * (hid_p + ncls_p) * 4    # biases, f32
        + tb * (hid_p + ncls_p) * 4   # f32 intermediates (hidden / logits)
    )
    vmem_limit = min(max(int(vmem_bytes * 1.5), 8 << 20), 48 << 20)

    grid = (pl.cdiv(b_pad, tb),)

    out = pl.pallas_call(
        _mlp_kernel,
        out_shape=jax.ShapeDtypeStruct((b_pad, ncls_p), jnp.float32),
        grid=grid,
        in_specs=[
            pl.BlockSpec((tb, din_p), lambda i: (i, 0)),     # activations stream
            pl.BlockSpec((din_p, hid_p), lambda i: (0, 0)),  # W1 resident
            pl.BlockSpec((1, hid_p), lambda i: (0, 0)),      # b1 resident
            pl.BlockSpec((hid_p, ncls_p), lambda i: (0, 0)), # W2 resident
            pl.BlockSpec((1, ncls_p), lambda i: (0, 0)),     # b2 resident
        ],
        out_specs=pl.BlockSpec((tb, ncls_p), lambda i: (i, 0)),
        compiler_params=pltpu.CompilerParams(
            dimension_semantics=("parallel",),   # megacore sharding on v7x
            vmem_limit_bytes=vmem_limit,
        ),
        cost_estimate=pl.CostEstimate(
            flops=2 * b_pad * (din_p * hid_p + hid_p * ncls_p),
            transcendentals=0,
            bytes_accessed=(x_p.size * 2 + w1_p.size * 2 + w2_p.size * 2
                            + b1_p.size * 4 + b2_p.size * 4
                            + b_pad * ncls_p * 4),
        ),
    )(x_p, w1_p, b1_p, w2_p, b2_p)

    return out[:B, :ncls]


def init_params(key, din, hid, ncls):
    """Deterministic (PRNGKey-seeded) parameter init, like nn.Linear defaults."""
    k1, k2 = jax.random.split(key)
    lim1 = 1.0 / jnp.sqrt(din)
    lim2 = 1.0 / jnp.sqrt(hid)
    w1 = jax.random.uniform(k1, (din, hid), jnp.float32, -lim1, lim1)
    b1 = jnp.zeros((1, hid), jnp.float32)
    w2 = jax.random.uniform(k2, (hid, ncls), jnp.float32, -lim2, lim2)
    b2 = jnp.zeros((1, ncls), jnp.float32)
    return (w1, b1, w2, b2)


if __name__ == "__main__":
    # Small shapes consistent with the module's image-classifier usage.
    B, C, H, W = 2, 4, 16, 16
    HID, NCLS = 32, 10

    key = jax.random.PRNGKey(0)
    kx, kp = jax.random.split(key)
    x = jax.random.normal(kx, (B, C, H, W), jnp.float32)      # NCHW, like PyTorch

    params = init_params(kp, C * H * W, HID, NCLS)

    # sequential=None path of BaseModel.forward
    assert base_model_forward(x, None) is None

    # sequential path (fused Pallas kernel)
    fwd = jax.jit(base_model_forward)
    y = jax.block_until_ready(fwd(x, params))
    assert y.shape == (B, NCLS)

    # Cross-check: bf16-rounded-input reference (matches kernel compute dtype)...
    w1, b1, w2, b2 = params
    x_flat = x.reshape(B, -1)
    xb = x_flat.astype(jnp.bfloat16).astype(jnp.float32)
    w1b = w1.astype(jnp.bfloat16).astype(jnp.float32)
    w2b = w2.astype(jnp.bfloat16).astype(jnp.float32)
    hb = jnp.maximum(xb @ w1b + b1, 0.0)
    ref_bf = hb.astype(jnp.bfloat16).astype(jnp.float32) @ w2b + b2
    assert jnp.allclose(y, ref_bf, atol=2e-3, rtol=2e-3)

    # ...and a pure-f32 reference with bf16-level tolerance.
    ref_f32 = jnp.maximum(x_flat @ w1 + b1, 0.0) @ w2 + b2
    assert jnp.allclose(y, ref_f32, atol=5e-2, rtol=5e-2)

    print("KERNEL_OK")
</pallas_src>

<mosaic_0001>
module attributes {stable_mosaic.version = 11 : i64} {
  func.func @_mlp_kernel(%arg0: i32, %arg1: memref<8x1024xbf16, #tpu.memory_space<vmem>>, %arg2: memref<1024x128xbf16, #tpu.memory_space<vmem>>, %arg3: memref<1x128xf32, #tpu.memory_space<vmem>>, %arg4: memref<128x128xbf16, #tpu.memory_space<vmem>>, %arg5: memref<1x128xf32, #tpu.memory_space<vmem>>, %arg6: memref<8x128xf32, #tpu.memory_space<vmem>>) attributes {dimension_semantics = [#tpu.dimension_semantics<parallel>], iteration_bounds = array<i64: 1>, scalar_prefetch = 0 : i64, scratch_operands = 0 : i64, tpu.core_type = #tpu.core_type<tc>, window_params = [{transform_indices = @transform_0, window_bounds = array<i64: 8, 1024>}, {pipeline_mode = #tpu.pipeline_mode<synchronous>, transform_indices = @transform_1, window_bounds = array<i64: 1024, 128>}, {pipeline_mode = #tpu.pipeline_mode<synchronous>, transform_indices = @transform_2, window_bounds = array<i64: 1, 128>}, {pipeline_mode = #tpu.pipeline_mode<synchronous>, transform_indices = @transform_3, window_bounds = array<i64: 128, 128>}, {pipeline_mode = #tpu.pipeline_mode<synchronous>, transform_indices = @transform_4, window_bounds = array<i64: 1, 128>}, {transform_indices = @transform_5, window_bounds = array<i64: 8, 128>}]} {
    %c0 = arith.constant 0 : index
    %c0_0 = arith.constant 0 : index
    %0 = vector.load %arg1[%c0, %c0_0] : memref<8x1024xbf16, #tpu.memory_space<vmem>>, vector<8x1024xbf16>
    %c0_1 = arith.constant 0 : index
    %c0_2 = arith.constant 0 : index
    %1 = vector.load %arg2[%c0_1, %c0_2] : memref<1024x128xbf16, #tpu.memory_space<vmem>>, vector<1024x128xbf16>
    %cst = arith.constant dense<0.000000e+00> : vector<8x128xf32>
    %2 = tpu.matmul %0, %1, %cst {dimension_numbers = #tpu.dot_dimension_numbers<[1], [0], [0], [1], [0, 0, 1, 1], [], []>} : vector<8x1024xbf16>, vector<1024x128xbf16>, vector<8x128xf32> -> vector<8x128xf32>
    %c0_3 = arith.constant 0 : index
    %c0_4 = arith.constant 0 : index
    %3 = vector.load %arg3[%c0_3, %c0_4] : memref<1x128xf32, #tpu.memory_space<vmem>>, vector<1x128xf32>
    %4 = vector.broadcast %3 : vector<1x128xf32> to vector<8x128xf32>
    %5 = arith.addf %2, %4 : vector<8x128xf32>
    %cst_5 = arith.constant 0.000000e+00 : f32
    %6 = vector.broadcast %cst_5 : f32 to vector<8x128xf32>
    %7 = arith.maximumf %5, %6 : vector<8x128xf32>
    %8 = arith.truncf %7 : vector<8x128xf32> to vector<8x128xbf16>
    %c0_6 = arith.constant 0 : index
    %c0_7 = arith.constant 0 : index
    %9 = vector.load %arg4[%c0_6, %c0_7] : memref<128x128xbf16, #tpu.memory_space<vmem>>, vector<128x128xbf16>
    %cst_8 = arith.constant dense<0.000000e+00> : vector<8x128xf32>
    %10 = tpu.matmul %8, %9, %cst_8 {dimension_numbers = #tpu.dot_dimension_numbers<[1], [0], [0], [1], [0, 0, 1, 1], [], []>} : vector<8x128xbf16>, vector<128x128xbf16>, vector<8x128xf32> -> vector<8x128xf32>
    %c0_9 = arith.constant 0 : index
    %c0_10 = arith.constant 0 : index
    %11 = vector.load %arg5[%c0_9, %c0_10] : memref<1x128xf32, #tpu.memory_space<vmem>>, vector<1x128xf32>
    %12 = vector.broadcast %11 : vector<1x128xf32> to vector<8x128xf32>
    %13 = arith.addf %10, %12 : vector<8x128xf32>
    %c0_11 = arith.constant 0 : index
    %c0_12 = arith.constant 0 : index
    %14 = vector.load %arg6[%c0_11, %c0_12] : memref<8x128xf32, #tpu.memory_space<vmem>>, vector<8x128xf32>
    tpu.vector_store %arg6[%c0_11, %c0_12], %13 {strides = array<i32>} : memref<8x128xf32, #tpu.memory_space<vmem>>, vector<8x128xf32>,
    return
  }
  func.func @transform_0(%arg0: i32) -> (i32, i32) {
    %c0_i32 = arith.constant 0 : i32
    %c0_i32_0 = arith.constant 0 : i32
    return %arg0, %c0_i32 : i32, i32
  }
  func.func @transform_1(%arg0: i32) -> (i32, i32) {
    %c0_i32 = arith.constant 0 : i32
    %c0_i32_0 = arith.constant 0 : i32
    %c0_i32_1 = arith.constant 0 : i32
    return %c0_i32, %c0_i32_0 : i32, i32
  }
  func.func @transform_2(%arg0: i32) -> (i32, i32) {
    %c0_i32 = arith.constant 0 : i32
    %c0_i32_0 = arith.constant 0 : i32
    %c0_i32_1 = arith.constant 0 : i32
    return %c0_i32, %c0_i32_0 : i32, i32
  }
  func.func @transform_3(%arg0: i32) -> (i32, i32) {
    %c0_i32 = arith.constant 0 : i32
    %c0_i32_0 = arith.constant 0 : i32
    %c0_i32_1 = arith.constant 0 : i32
    return %c0_i32, %c0_i32_0 : i32, i32
  }
  func.func @transform_4(%arg0: i32) -> (i32, i32) {
    %c0_i32 = arith.constant 0 : i32
    %c0_i32_0 = arith.constant 0 : i32
    %c0_i32_1 = arith.constant 0 : i32
    return %c0_i32, %c0_i32_0 : i32, i32
  }
  func.func @transform_5(%arg0: i32) -> (i32, i32) {
    %c0_i32 = arith.constant 0 : i32
    %c0_i32_0 = arith.constant 0 : i32
    return %arg0, %c0_i32 : i32, i32
  }
}

</mosaic_0001>

<bundles_post_ra>
// kernel: base_model_forward.1
= control target key start
LH: loop header
LB: loop body
LE: loop exit
PB: predicated region body
PF: predicated region fallthrough
CT: control target
= control target key end

     0   :  { %vm1132_vm0 = vmmov 0   ;;  %s1400_s1 = inlined_call_operand.vmem [shape: bf16[1024,128], index: 1, kind: input, shape index: {}]   ;;  %s1401_s0 = inlined_call_operand.vmem [shape: bf16[8,1024], index: 0, kind: input, shape index: {}]   ;;  %s1402_s3 = inlined_call_operand.vmem [shape: bf16[128,128], index: 3, kind: input, shape index: {}]   ;;  %s1403_s2 = inlined_call_operand.vmem [shape: f32[1,128], index: 2, kind: input, shape index: {}]   ;;  %s1404_s4 = inlined_call_operand.vmem [shape: f32[1,128], index: 4, kind: input, shape index: {}]   ;;  %s1405_s5 = inlined_call_operand.vmem [shape: f32[8,128], index: 5, kind: output, shape index: {}]  }
   0x1   :  { %v1051_v0 = vld [vmem:[%s1400_s1 + $0x40] sm:$0xff]   ;;  %v1055_v4 = vld [vmem:[%s1400_s1 + $0x48] sm:$0xff]   ;;  %v1059_v8 = vld [vmem:[%s1400_s1 + $0x50] sm:$0xff]  }
   0x2   :  { %v1052_v1 = vld [vmem:[%s1400_s1 + $0xc0] sm:$0xff]   ;;  %932 = vmatprep.subr.bf16.mxu0 %v1051_v0  ;;  %v1056_v5 = vld [vmem:[%s1400_s1 + $0xc8] sm:$0xff]   ;;  %v1060_v9 = vld [vmem:[%s1400_s1 + $0xd0] sm:$0xff]  }
   0x3   :  { %v1053_v2 = vld [vmem:[%s1400_s1] sm:$0xff]   ;;  %954 = vmatprep.subr.bf16.mxu1 %v1052_v1  ;;  %v1057_v6 = vld [vmem:[%s1400_s1 + $0x8] sm:$0xff]   ;;  %v1061_v10 = vld [vmem:[%s1400_s1 + $0x10] sm:$0xff]  }
   0x4   :  { %v1054_v3 = vld [vmem:[%s1400_s1 + $0x80] sm:$0xff]   ;;  %933 = vmatpush3.bf16.msra.mxu0 %v1053_v2  ;;  %v1058_v7 = vld [vmem:[%s1400_s1 + $0x88] sm:$0xff]   ;;  %v1062_v11 = vld [vmem:[%s1400_s1 + $0x90] sm:$0xff]  }
   0x5   :  { %955 = vmatpush3.bf16.msra.mxu1 %v1054_v3  ;;  %934 = vmatprep.subr.bf16.mxu0 %v1055_v4  ;;  %v1063_v12 = vld [vmem:[%s1400_s1 + $0x58] sm:$0xff]   ;;  %v1067_v16 = vld [vmem:[%s1400_s1 + $0x60] sm:$0xff]   ;;  %v1071_v20 = vld [vmem:[%s1400_s1 + $0x68] sm:$0xff]  }
   0x6   :  { %956 = vmatprep.subr.bf16.mxu1 %v1056_v5  ;;  %v1064_v13 = vld [vmem:[%s1400_s1 + $0xd8] sm:$0xff]   ;;  %v1068_v17 = vld [vmem:[%s1400_s1 + $0xe0] sm:$0xff]   ;;  %v1072_v21 = vld [vmem:[%s1400_s1 + $0xe8] sm:$0xff]  }
   0x7   :  { %v1065_v14 = vld [vmem:[%s1400_s1 + $0x18] sm:$0xff]   ;;  %v1069_v18 = vld [vmem:[%s1400_s1 + $0x20] sm:$0xff]   ;;  %v1073_v22 = vld [vmem:[%s1400_s1 + $0x28] sm:$0xff]  }
   0x8   :  { %935 = vmatpush3.bf16.msra.mxu0 %v1057_v6  ;;  %v1066_v15 = vld [vmem:[%s1400_s1 + $0x98] sm:$0xff]   ;;  %v1070_v19 = vld [vmem:[%s1400_s1 + $0xa0] sm:$0xff]   ;;  %v1074_v23 = vld [vmem:[%s1400_s1 + $0xa8] sm:$0xff]  }
   0x9   :  { %957 = vmatpush3.bf16.msra.mxu1 %v1058_v7  ;;  %936 = vmatprep.subr.bf16.mxu0 %v1059_v8  ;;  %v1075_v24 = vld [vmem:[%s1400_s1 + $0x70] sm:$0xff]   ;;  %v1079_v28 = vld [vmem:[%s1400_s1 + $0x78] sm:$0xff]   ;;  %v21_v32 = vld [vmem:[%s1401_s0] sm:$0xff] }
   0xa   :  { %958 = vmatprep.subr.bf16.mxu1 %v1060_v9  ;;  %v1076_v25 = vld [vmem:[%s1400_s1 + $0xf0] sm:$0xff]   ;;  %v1080_v29 = vld [vmem:[%s1400_s1 + $0xf8] sm:$0xff]   ;;  %v22_v33 = vld [vmem:[%s1401_s0 + $0x8] sm:$0xff]  ;;  %v851_v34 = vcombine.low %v21_v32, %v21_v32  ;;  %v852_v35 = vcombine.high %v21_v32, %v21_v32 }
   0xb   :  { %v1077_v26 = vld [vmem:[%s1400_s1 + $0x30] sm:$0xff]   ;;  %v1081_v30 = vld [vmem:[%s1400_s1 + $0x38] sm:$0xff]   ;;  %v853_v36 = vcombine.low %v22_v33, %v22_v33  ;;  %v854_v37 = vcombine.high %v22_v33, %v22_v33  ;;  %v1087_v38 = vld [vmem:[%s1400_s1 + $0x140] sm:$0xff]  }
   0xc   :  { %937 = vmatpush3.bf16.msra.mxu0 %v1061_v10  ;;  %v1078_v27 = vld [vmem:[%s1400_s1 + $0xb0] sm:$0xff]   ;;  %v1082_v31 = vld [vmem:[%s1400_s1 + $0xb8] sm:$0xff]   ;;  %v1088_v39 = vld [vmem:[%s1400_s1 + $0x1c0] sm:$0xff]   ;;  %604 = vmatprep.mubr.bf16.mxu0 %v852_v35 }
   0xd   :  { %959 = vmatpush3.bf16.msra.mxu1 %v1062_v11  ;;  %938 = vmatprep.subr.bf16.mxu0 %v1063_v12  ;;  %v1089_v40 = vld [vmem:[%s1400_s1 + $0x100] sm:$0xff]   ;;  %v1091_v42 = vld [vmem:[%s1400_s1 + $0x148] sm:$0xff]   ;;  %v1095_v46 = vld [vmem:[%s1400_s1 + $0x150] sm:$0xff]   ;;  %v1131_v12 = vmov 0.0  }
   0xe   :  { %960 = vmatprep.subr.bf16.mxu1 %v1064_v13  ;;  %644 = vmatprep.mubr.bf16.mxu1 %v854_v37  ;;  %v1090_v41 = vld [vmem:[%s1400_s1 + $0x180] sm:$0xff]   ;;  %v1092_v43 = vld [vmem:[%s1400_s1 + $0x1c8] sm:$0xff]   ;;  %v1096_v47 = vld [vmem:[%s1400_s1 + $0x1d0] sm:$0xff]  }
   0xf   :  { %v1093_v44 = vld [vmem:[%s1400_s1 + $0x108] sm:$0xff]   ;;  %v1097_v48 = vld [vmem:[%s1400_s1 + $0x110] sm:$0xff]   ;;  %v1099_v50 = vld [vmem:[%s1400_s1 + $0x158] sm:$0xff]  }
  0x10   :  { %939 = vmatpush3.bf16.msra.mxu0 %v1065_v14  ;;  %v1094_v45 = vld [vmem:[%s1400_s1 + $0x188] sm:$0xff]   ;;  %v1098_v49 = vld [vmem:[%s1400_s1 + $0x190] sm:$0xff]   ;;  %v1100_v51 = vld [vmem:[%s1400_s1 + $0x1d8] sm:$0xff]  }
  0x11   :  { %961 = vmatpush3.bf16.msra.mxu1 %v1066_v15  ;;  %940 = vmatprep.subr.bf16.mxu0 %v1067_v16  ;;  %v1101_v52 = vld [vmem:[%s1400_s1 + $0x118] sm:$0xff]   ;;  %v1103_v54 = vld [vmem:[%s1400_s1 + $0x160] sm:$0xff]   ;;  %v1107_v58 = vld [vmem:[%s1400_s1 + $0x168] sm:$0xff]  }
  0x12   :  { %962 = vmatprep.subr.bf16.mxu1 %v1068_v17  ;;  %v1102_v53 = vld [vmem:[%s1400_s1 + $0x198] sm:$0xff]   ;;  %v1104_v55 = vld [vmem:[%s1400_s1 + $0x1e0] sm:$0xff]   ;;  %v1108_v59 = vld [vmem:[%s1400_s1 + $0x1e8] sm:$0xff]  }
  0x13   :  { %v1105_v56 = vld [vmem:[%s1400_s1 + $0x120] sm:$0xff]   ;;  %v1109_v60 = vld [vmem:[%s1400_s1 + $0x128] sm:$0xff]   ;;  %v1111_v62 = vld [vmem:[%s1400_s1 + $0x170] sm:$0xff]  }
  0x14   :  { %941 = vmatpush3.bf16.msra.mxu0 %v1069_v18  ;;  %v1106_v57 = vld [vmem:[%s1400_s1 + $0x1a0] sm:$0xff]   ;;  %v1110_v61 = vld [vmem:[%s1400_s1 + $0x1a8] sm:$0xff]   ;;  %v1112_v63 = vld [vmem:[%s1400_s1 + $0x1f0] sm:$0xff]  }
  0x15   :  { %963 = vmatpush3.bf16.msra.mxu1 %v1070_v19  ;;  %942 = vmatprep.subr.bf16.mxu0 %v1071_v20  ;;  %v1113_v0 = vld [vmem:[%s1400_s1 + $0x130] sm:$0xff]   ;;  %v1115_v2 = vld [vmem:[%s1400_s1 + $0x178] sm:$0xff]   ;;  %v1123_v13 = vld [vmem:[%s1402_s3] sm:$0xff]  }
  0x16   :  { %964 = vmatprep.subr.bf16.mxu1 %v1072_v21  ;;  %v1114_v1 = vld [vmem:[%s1400_s1 + $0x1b0] sm:$0xff]   ;;  %v1116_v3 = vld [vmem:[%s1400_s1 + $0x1f8] sm:$0xff]   ;;  %v1124_v14 = vld [vmem:[%s1402_s3 + $0x8] sm:$0xff]  }
  0x17   :  { %v1117_v4 = vld [vmem:[%s1400_s1 + $0x138] sm:$0xff]   ;;  %v23_v6 = vld [vmem:[%s1401_s0 + $0x10] sm:$0xff]  ;;  %v1127_v17 = vld [vmem:[%s1402_s3 + $0x20] sm:$0xff]  }
  0x18   :  { %943 = vmatpush3.bf16.msra.mxu0 %v1073_v22  ;;  %v1118_v5 = vld [vmem:[%s1400_s1 + $0x1b8] sm:$0xff]   ;;  %v855_v7 = vcombine.low %v23_v6, %v23_v6  ;;  %v856_v8 = vcombine.high %v23_v6, %v23_v6  ;;  %v1125_v15 = vld [vmem:[%s1402_s3 + $0x10] sm:$0xff]   ;;  %v1128_v18 = vld [vmem:[%s1402_s3 + $0x28] sm:$0xff]  }
  0x19   :  { %965 = vmatpush3.bf16.msra.mxu1 %v1074_v23  ;;  %944 = vmatprep.subr.bf16.mxu0 %v1075_v24  ;;  %v24_v9 = vld [vmem:[%s1401_s0 + $0x18] sm:$0xff]  ;;  %v1129_v19 = vld [vmem:[%s1402_s3 + $0x30] sm:$0xff]   ;;  %v850_v23 = vld [vmem:[%s1403_s2] ss:$0 sm:$0xff] }
  0x1a   :  { %966 = vmatprep.subr.bf16.mxu1 %v1076_v25  ;;  %v857_v10 = vcombine.low %v24_v9, %v24_v9  ;;  %v858_v11 = vcombine.high %v24_v9, %v24_v9  ;;  %v1126_v16 = vld [vmem:[%s1402_s3 + $0x18] sm:$0xff]  }
  0x1b   :  { %v1130_v20 = vld [vmem:[%s1402_s3 + $0x38] sm:$0xff]  }
  0x1c   :  { %945 = vmatpush3.bf16.msra.mxu0 %v1077_v26 }
  0x1d   :  { %967 = vmatpush3.bf16.msra.mxu1 %v1078_v27  ;;  %946 = vmatprep.subr.bf16.mxu0 %v1079_v28 }
  0x1e   :  { %968 = vmatprep.subr.bf16.mxu1 %v1080_v29 }
  0x20   :  { %947 = vmatpush3.bf16.msra.mxu0 %v1081_v30 }
  0x21   :  { %969 = vmatpush3.bf16.msra.mxu1 %v1082_v31  ;;  %976 = vmatprep.subr.bf16.mxu0 %v1087_v38 }
  0x22   :  { %998 = vmatprep.subr.bf16.mxu1 %v1088_v39 }
  0x23   :  { %605 = vmatmul.mubr.bf16.vlgmr.msra.gmra.mrb[0].mxu0 %v851_v34 }
  0x24   :  { %645 = vmatmul.mubr.bf16.vlgmr.msra.gmra.mrb[0].mxu1 %v853_v36  ;;  %977 = vmatpush3.bf16.msra.mxu0 %v1089_v40 }
  0x25   :  { %999 = vmatpush3.bf16.msra.mxu1 %v1090_v41  ;;  %978 = vmatprep.subr.bf16.mxu0 %v1091_v42 }
  0x26   :  { %1000 = vmatprep.subr.bf16.mxu1 %v1092_v43  ;;  %684 = vmatprep.mubr.bf16.mxu0 %v856_v8 }
  0x27   :  { %724 = vmatprep.mubr.bf16.mxu1 %v858_v11 }
  0x28   :  { %979 = vmatpush3.bf16.msra.mxu0 %v1093_v44 }
  0x29   :  { %1001 = vmatpush3.bf16.msra.mxu1 %v1094_v45  ;;  %980 = vmatprep.subr.bf16.mxu0 %v1095_v46 }
  0x2a   :  { %1002 = vmatprep.subr.bf16.mxu1 %v1096_v47 }
  0x2c   :  { %981 = vmatpush3.bf16.msra.mxu0 %v1097_v48  ;;  %v923_v48 = vld [vmem:[%s1404_s4] ss:$0 sm:$0xff] }
  0x2d   :  { %1003 = vmatpush3.bf16.msra.mxu1 %v1098_v49  ;;  %982 = vmatprep.subr.bf16.mxu0 %v1099_v50 }
  0x2e   :  { %1004 = vmatprep.subr.bf16.mxu1 %v1100_v51 }
  0x30   :  { %983 = vmatpush3.bf16.msra.mxu0 %v1101_v52 }
  0x31   :  { %1005 = vmatpush3.bf16.msra.mxu1 %v1102_v53  ;;  %984 = vmatprep.subr.bf16.mxu0 %v1103_v54 }
  0x32   :  { %1006 = vmatprep.subr.bf16.mxu1 %v1104_v55 }
  0x34   :  { %985 = vmatpush3.bf16.msra.mxu0 %v1105_v56 }
  0x35   :  { %1007 = vmatpush3.bf16.msra.mxu1 %v1106_v57  ;;  %986 = vmatprep.subr.bf16.mxu0 %v1107_v58 }
  0x36   :  { %1008 = vmatprep.subr.bf16.mxu1 %v1108_v59 }
  0x38   :  { %987 = vmatpush3.bf16.msra.mxu0 %v1109_v60 }
  0x39   :  { %1009 = vmatpush3.bf16.msra.mxu1 %v1110_v61  ;;  %988 = vmatprep.subr.bf16.mxu0 %v1111_v62 }
  0x3a   :  { %1010 = vmatprep.subr.bf16.mxu1 %v1112_v63 }
  0x3c   :  { %989 = vmatpush3.bf16.msra.mxu0 %v1113_v0 }
  0x3d   :  { %1011 = vmatpush3.bf16.msra.mxu1 %v1114_v1  ;;  %990 = vmatprep.subr.bf16.mxu0 %v1115_v2 }
  0x3e   :  { %1012 = vmatprep.subr.bf16.mxu1 %v1116_v3 }
  0x40   :  { %991 = vmatpush3.bf16.msra.mxu0 %v1117_v4 }
  0x41   :  { %1013 = vmatpush3.bf16.msra.mxu1 %v1118_v5  ;;  %1029 = vmatprep.subr.bf16.mxu0 %v1131_v12 }
  0x43   :  { %685 = vmatmul.mubr.bf16.vlgmr.msra.gmra.mrb[4].mxu0 %v855_v7 }
  0x44   :  { %725 = vmatmul.mubr.bf16.vlgmr.msra.gmra.mrb[4].mxu1 %v857_v10  ;;  %1030 = vmatpush3.bf16.msra.mxu0 %v1123_v13 }
  0x45   :  { %1031 = vmatprep.subr.bf16.mxu0 %v1131_v12  ;;  %1045 = vmatprep.mubr.msk.bf16.mxu0 %vm1132_vm0, %v1131_v12 }
  0x48   :  { %1032 = vmatpush3.bf16.msra.mxu0 %v1124_v14 }
  0x49   :  { %1033 = vmatprep.subr.bf16.mxu0 %v1131_v12 }
  0x4c   :  { %1034 = vmatpush3.bf16.msra.mxu0 %v1125_v15 }
  0x4d   :  { %1035 = vmatprep.subr.bf16.mxu0 %v1131_v12 }
  0x50   :  { %1036 = vmatpush3.bf16.msra.mxu0 %v1126_v16 }
  0x51   :  { %1037 = vmatprep.subr.bf16.mxu0 %v1131_v12 }
  0x54   :  { %1038 = vmatpush3.bf16.msra.mxu0 %v1127_v17 }
  0x55   :  { %1039 = vmatprep.subr.bf16.mxu0 %v1131_v12 }
  0x58   :  { %1040 = vmatpush3.bf16.msra.mxu0 %v1128_v18 }
  0x59   :  { %1041 = vmatprep.subr.bf16.mxu0 %v1131_v12 }
  0x5c   :  { %1042 = vmatpush3.bf16.msra.mxu0 %v1129_v19 }
  0x5d   :  { %1043 = vmatprep.subr.bf16.mxu0 %v1131_v12 }
  0x60   :  { %1044 = vmatpush3.bf16.msra.mxu0 %v1130_v20 }
  0xf6   :  { %v948_v21 = vpop.f32.mrb[0].mxu0 }
  0xf7   :  { %v970_v22 = vpop.f32.mrb[0].mxu1  ;;  %v949_v24 = vpop.f32.mrb[1].mxu0 }
  0xf8   :  { %v971_v25 = vpop.f32.mrb[1].mxu1  ;;  %v950_v26 = vadd.f32 %v949_v24, %v948_v21  ;;  %v951_v28 = vpop.f32.mrb[2].mxu0 }
  0xf9   :  { %v972_v27 = vadd.f32 %v971_v25, %v970_v22  ;;  %v973_v29 = vpop.f32.mrb[2].mxu1  ;;  %v952_v30 = vpop.f32.mrb[3].mxu0 }
  0xfa   :  { %v974_v31 = vpop.f32.mrb[3].mxu1  ;;  %v607_v32 = vadd.f32 %v950_v26, %v850_v23 }
  0xfc   :  { %v647_v33 = vadd.f32 %v972_v27, %v607_v32 }
 0x116   :  { %v992_v34 = vpop.f32.mrb[4].mxu0 }
 0x117   :  { %v1014_v35 = vpop.f32.mrb[4].mxu1  ;;  %v993_v36 = vpop.f32.mrb[5].mxu0 }
 0x118   :  { %v1015_v37 = vpop.f32.mrb[5].mxu1  ;;  %v994_v38 = vadd.f32 %v993_v36, %v992_v34  ;;  %v995_v40 = vpop.f32.mrb[6].mxu0 }
 0x119   :  { %v1016_v39 = vadd.f32 %v1015_v37, %v1014_v35  ;;  %v1017_v41 = vpop.f32.mrb[6].mxu1  ;;  %v996_v42 = vpop.f32.mrb[7].mxu0 }
 0x11a   :  { %v1018_v43 = vpop.f32.mrb[7].mxu1  ;;  %v687_v44 = vadd.f32 %v994_v38, %v647_v33 }
 0x11c   :  { %v727_v45 = vadd.f32 %v1016_v39, %v687_v44 }
 0x11e   :  { %v732_v46 = vmax.f32 %v727_v45, 0.0 }
 0x120   :  { %v733_v47 = vpack.c.bf16 %v732_v46, %v732_v46 }
 0x122   :  { %1046 = vmatmul.mubr.bf16.vlgmr.msra.gmra.mrb[8].mxu0 %v733_v47 }
 0x1f5   :  { %v839_v49 = vpop.f32.mrb[8].mxu0 }
 0x1f6   :  { %v840_v50 = vadd.f32 %v923_v48, %v839_v49  ;;  %v1047_v51 = vpop.f32.mrb[9].mxu0 }
 0x1f7   :  { %v842_v52 = vpop.f32.mrb[10].mxu0 }
 0x1f8   :  { %845 = vst [vmem:[%s1405_s5] sm:$0xff] %v840_v50  ;;  %v1048_v53 = vpop.f32.mrb[11].mxu0 }

</bundles_post_ra>
